<compile_context>
chip_gen: v7x
topology: tpu7x:2x2x1
jax: 0.10.0
libtpu: 0.0.40
codegen_flags: <defaults>
</compile_context>

<pallas_src>
import jax
import jax.numpy as jnp
from jax.experimental import pallas as pl
from jax.experimental.pallas import tpu as pltpu


def _round_up(x: int, m: int) -> int:
    return ((x + m - 1) // m) * m


# ---------------------------------------------------------------------------
# Fast path: whole weight resident in VMEM, single dot per row-tile.
# ---------------------------------------------------------------------------
def affine_kernel_resident(x_ref, w_ref, b_ref, o_ref):
    # x_ref: [TM, D] streamed activation tile
    # w_ref: [D, D]  weight in (in, out) layout (resident)
    # b_ref: [1, D]  folded bias (resident)
    y = jnp.dot(x_ref[...], w_ref[...], preferred_element_type=jnp.float32)
    o_ref[...] = (y + b_ref[...]).astype(o_ref.dtype)


# ---------------------------------------------------------------------------
# Large-D path: tiled matmul with f32 accumulator, bias fused at finalize.
# ---------------------------------------------------------------------------
def affine_kernel_tiled(x_ref, w_ref, b_ref, o_ref, acc_ref):
    k = pl.program_id(2)

    @pl.when(k == 0)
    def _():
        acc_ref[...] = jnp.zeros_like(acc_ref)

    acc_ref[...] += jnp.dot(x_ref[...], w_ref[...],
                            preferred_element_type=jnp.float32)

    @pl.when(k == pl.num_programs(2) - 1)
    def _():
        o_ref[...] = (acc_ref[...] + b_ref[...]).astype(o_ref.dtype)


def affine_transform(x, weight, b_linear, bias_extra, *, tm=512):
    """x: [B, S, D] -> [B, S, D], computing Linear(x) + bias_extra (PyTorch semantics).

    weight: [out_features, in_features] = [D, D] (nn.Linear layout)
    b_linear, bias_extra: [D]
    """
    B, S, D = x.shape
    M = B * S
    x2 = x.reshape(M, D)
    itemsize = jnp.dtype(x.dtype).itemsize

    # One-time wrapper-side layout plumbing (cheap XLA ops, outside the grid loop):
    #   * transpose weight to [in, out] so the kernel contracts on its last/first dims
    #   * fold the two biases into one vector
    w_t = jnp.transpose(weight)                                   # [D_in, D_out]
    bias = (b_linear + bias_extra).reshape(1, D).astype(jnp.float32)

    # Row tile: multiple of 8 sublanes, clamped to the (padded) problem size.
    TM = min(tm, _round_up(M, 8))
    Mp = _round_up(M, TM)
    if Mp != M:
        x2 = jnp.pad(x2, ((0, Mp - M), (0, 0)))
    grid_m = Mp // TM

    w_bytes = D * D * jnp.dtype(weight.dtype).itemsize
    cost = pl.CostEstimate(
        flops=2 * Mp * D * D,
        transcendentals=0,
        bytes_accessed=(Mp * D * itemsize * 2) + w_bytes + D * 4,
    )

    # Choose resident-weight fast path if the weight comfortably fits in VMEM
    # (leave room for double-buffered x/out tiles on all chips incl. v7x 64 MiB).
    use_resident = (w_bytes <= (16 << 20)) or (D % 128 != 0)

    if use_resident:
        tile_bytes = 2 * TM * D * itemsize          # x double-buffered
        tile_bytes += 2 * TM * D * itemsize         # out double-buffered
        vmem_limit = int(1.5 * (tile_bytes + w_bytes + D * 4)) + (1 << 20)
        vmem_limit = max(min(vmem_limit, 100 << 20), 4 << 20)

        out2 = pl.pallas_call(
            affine_kernel_resident,
            out_shape=jax.ShapeDtypeStruct((Mp, D), x.dtype),
            grid=(grid_m,),
            in_specs=[
                pl.BlockSpec((TM, D), lambda i: (i, 0)),   # streamed activations
                pl.BlockSpec((D, D), lambda i: (0, 0)),    # resident weight (in, out)
                pl.BlockSpec((1, D), lambda i: (0, 0)),    # resident folded bias
            ],
            out_specs=pl.BlockSpec((TM, D), lambda i: (i, 0)),
            compiler_params=pltpu.CompilerParams(
                dimension_semantics=("parallel",),
                vmem_limit_bytes=vmem_limit,
            ),
            cost_estimate=cost,
        )(x2, w_t, bias)
    else:
        # D is large and a multiple of 128: tile N and K.
        def pick_tile(d):
            for t in (512, 256, 128):
                if d % t == 0:
                    return t
            return d
        TN = pick_tile(D)
        TK = pick_tile(D)
        grid_n = D // TN
        grid_k = D // TK

        tile_bytes = 2 * TM * TK * itemsize                         # x
        tile_bytes += 2 * TK * TN * jnp.dtype(weight.dtype).itemsize  # w
        tile_bytes += 2 * TM * TN * itemsize                        # out
        tile_bytes += TM * TN * 4                                   # acc scratch
        vmem_limit = int(1.5 * tile_bytes) + (2 << 20)
        vmem_limit = max(min(vmem_limit, 100 << 20), 8 << 20)

        out2 = pl.pallas_call(
            affine_kernel_tiled,
            out_shape=jax.ShapeDtypeStruct((Mp, D), x.dtype),
            grid=(grid_m, grid_n, grid_k),
            in_specs=[
                pl.BlockSpec((TM, TK), lambda i, j, k: (i, k)),   # x tile
                pl.BlockSpec((TK, TN), lambda i, j, k: (k, j)),   # weight tile (in, out)
                pl.BlockSpec((1, TN), lambda i, j, k: (0, j)),    # bias tile
            ],
            out_specs=pl.BlockSpec((TM, TN), lambda i, j, k: (i, j)),
            scratch_shapes=[pltpu.VMEM((TM, TN), jnp.float32)],
            compiler_params=pltpu.CompilerParams(
                dimension_semantics=("parallel", "parallel", "arbitrary"),
                vmem_limit_bytes=vmem_limit,
            ),
            cost_estimate=cost,
        )(x2, w_t, bias)

    if Mp != M:
        out2 = out2[:M]
    return out2.reshape(B, S, D)


if __name__ == "__main__":
    key = jax.random.PRNGKey(0)
    k_x, k_w, k_b = jax.random.split(key, 3)

    B, S, D = 2, 8, 32  # batch, seq, hidden (dim)
    # NOTE: D=32 is a toy shape (lane width < 128 -> masked stores); realistic
    # D should be a multiple of 128 for lane-dense stores and full MXU use.

    x = jax.random.normal(k_x, (B, S, D), dtype=jnp.float32)

    # nn.Linear-shaped params: W [out, in] = [D, D], b [D].
    bound = 1.0 / jnp.sqrt(D)
    weight = jax.random.uniform(k_w, (D, D), minval=-bound, maxval=bound,
                                dtype=jnp.float32)
    b_linear = jax.random.uniform(k_b, (D,), minval=-bound, maxval=bound,
                                  dtype=jnp.float32)
    bias_extra = jnp.zeros((D,), dtype=jnp.float32)  # nn.Parameter(torch.zeros(dim))

    out = affine_transform(x, weight, b_linear, bias_extra)
    jax.block_until_ready(out)

    # Reference check against plain JAX.
    ref = x @ weight.T + b_linear + bias_extra
    assert out.shape == (B, S, D)
    assert jnp.allclose(out, ref, atol=1e-5, rtol=1e-5)

    print("KERNEL_OK")
</pallas_src>

<mosaic_0001>
module attributes {stable_mosaic.version = 11 : i64} {
  func.func @affine_kernel_resident(%arg0: i32, %arg1: memref<16x32xf32, #tpu.memory_space<vmem>>, %arg2: memref<32x32xf32, #tpu.memory_space<vmem>>, %arg3: memref<1x32xf32, #tpu.memory_space<vmem>>, %arg4: memref<16x32xf32, #tpu.memory_space<vmem>>) attributes {dimension_semantics = [#tpu.dimension_semantics<parallel>], iteration_bounds = array<i64: 1>, scalar_prefetch = 0 : i64, scratch_operands = 0 : i64, tpu.core_type = #tpu.core_type<tc>, window_params = [{transform_indices = @transform_0, window_bounds = array<i64: 16, 32>}, {pipeline_mode = #tpu.pipeline_mode<synchronous>, transform_indices = @transform_1, window_bounds = array<i64: 32, 32>}, {pipeline_mode = #tpu.pipeline_mode<synchronous>, transform_indices = @transform_2, window_bounds = array<i64: 1, 32>}, {transform_indices = @transform_3, window_bounds = array<i64: 16, 32>}]} {
    %c0 = arith.constant 0 : index
    %c0_0 = arith.constant 0 : index
    %0 = vector.load %arg1[%c0, %c0_0] : memref<16x32xf32, #tpu.memory_space<vmem>>, vector<16x32xf32>
    %c0_1 = arith.constant 0 : index
    %c0_2 = arith.constant 0 : index
    %1 = vector.load %arg2[%c0_1, %c0_2] : memref<32x32xf32, #tpu.memory_space<vmem>>, vector<32x32xf32>
    %cst = arith.constant dense<0.000000e+00> : vector<16x32xf32>
    %2 = tpu.matmul %0, %1, %cst {dimension_numbers = #tpu.dot_dimension_numbers<[1], [0], [0], [1], [0, 0, 1, 1], [], []>} : vector<16x32xf32>, vector<32x32xf32>, vector<16x32xf32> -> vector<16x32xf32>
    %c0_3 = arith.constant 0 : index
    %c0_4 = arith.constant 0 : index
    %3 = vector.load %arg3[%c0_3, %c0_4] : memref<1x32xf32, #tpu.memory_space<vmem>>, vector<1x32xf32>
    %4 = vector.broadcast %3 : vector<1x32xf32> to vector<16x32xf32>
    %5 = arith.addf %2, %4 : vector<16x32xf32>
    %c0_5 = arith.constant 0 : index
    %c0_6 = arith.constant 0 : index
    %6 = vector.load %arg4[%c0_5, %c0_6] : memref<16x32xf32, #tpu.memory_space<vmem>>, vector<16x32xf32>
    tpu.vector_store %arg4[%c0_5, %c0_6], %5 {strides = array<i32>} : memref<16x32xf32, #tpu.memory_space<vmem>>, vector<16x32xf32>,
    return
  }
  func.func @transform_0(%arg0: i32) -> (i32, i32) {
    %c0_i32 = arith.constant 0 : i32
    %c0_i32_0 = arith.constant 0 : i32
    return %arg0, %c0_i32 : i32, i32
  }
  func.func @transform_1(%arg0: i32) -> (i32, i32) {
    %c0_i32 = arith.constant 0 : i32
    %c0_i32_0 = arith.constant 0 : i32
    %c0_i32_1 = arith.constant 0 : i32
    return %c0_i32, %c0_i32_0 : i32, i32
  }
  func.func @transform_2(%arg0: i32) -> (i32, i32) {
    %c0_i32 = arith.constant 0 : i32
    %c0_i32_0 = arith.constant 0 : i32
    %c0_i32_1 = arith.constant 0 : i32
    return %c0_i32, %c0_i32_0 : i32, i32
  }
  func.func @transform_3(%arg0: i32) -> (i32, i32) {
    %c0_i32 = arith.constant 0 : i32
    %c0_i32_0 = arith.constant 0 : i32
    return %arg0, %c0_i32 : i32, i32
  }
}

</mosaic_0001>

<bundles_post_ra>
// kernel: tpu_custom_call.1
= control target key start
LH: loop header
LB: loop body
LE: loop exit
PB: predicated region body
PF: predicated region fallthrough
CT: control target
= control target key end

     0   :  { %8 = vsyncpa [#allocation3], 0  ;;  %s340_s0 = inlined_call_operand.hbm [shape: f32[16,32], index: 0, kind: input, shape index: {}]   ;;  %s341_s1 = inlined_call_operand.hbm [shape: f32[32,32], index: 1, kind: input, shape index: {}]   ;;  %s342_s2 = inlined_call_operand.vmem [shape: f32[1,32], index: 2, kind: input, shape index: {}]   ;;  %s343_s3 = inlined_call_operand.hbm [shape: f32[16,32], index: 3, kind: output, shape index: {}]  }
   0x1   :  { %9 = vsyncpa [#allocation6], 0 }
   0x2   :  { %10 = vsyncpa [#allocation4], 0  ;;  %s263_s12 = smov [#allocation2]   ;;  %s191_s16 = scalar_lea.hbm %s340_s0, 256 }
   0x3   :  { %s16_s13 = sshll.u32 %s263_s12, 4  ;;  %p192_p0 = scmp.ne.s32.totalorder %s340_s0, %s191_s16  ;;  %s17_s13 = int_to_ptr.vmem [resolvable:$true] %s16_s13 }
   0x4   :  { %p195_p1 = scmp.lt.u32.totalorder %s191_s16, %s340_s0 }
   0x6   :  { %p197_p2 = pnand %p195_p1, %p192_p0 }
   0x8   :  { %200 = shalt.err (!%p197_p2)
}
   0x9   :  { %s201_s21 = scalar_lea.vmem %s17_s13, 256  ;;  %p206_p4 = scmp.lt.s32.totalorder %s17_s13, %s17_s13 }
   0xa   :  { %p202_p3 = scmp.ne.s32.totalorder %s17_s13, %s201_s21  ;;  %p207_p5 = scmp.lt.s32.totalorder %s201_s21, %s201_s21 }
   0xc   :  { %p208_p6 = por %p207_p5, %p206_p4 }
   0xe   :  { %p209_p7 = pnand %p208_p6, %p202_p3 }
  0x10   :  { %212 = shalt.err (!%p209_p7)
}
  0x11   :  { %s264_s22 = smov 128   ;;  %s265_s23 = smov 8  }
  0x12   :  { %22 = dma.hbm_to_vmem [thread:$0]  %s340_s0, 256, %s17_s13, [#allocation3], %s264_s22, %s264_s22, %s265_s23  }
  0x13   :  { %s266_s26 = smov [#allocation5]   ;;  %s213_s30 = scalar_lea.hbm %s341_s1, 512 }
  0x14   :  { %s28_s27 = sshll.u32 %s266_s26, 4  ;;  %p214_p8 = scmp.ne.s32.totalorder %s341_s1, %s213_s30  ;;  %s29_s27 = int_to_ptr.vmem [resolvable:$true] %s28_s27 }
  0x15   :  { %p217_p9 = scmp.lt.u32.totalorder %s213_s30, %s341_s1 }
  0x17   :  { %p219_p10 = pnand %p217_p9, %p214_p8 }
  0x19   :  { %222 = shalt.err (!%p219_p10)
}
  0x1a   :  { %s223_s8 = scalar_lea.vmem %s29_s27, 512  ;;  %p228_p12 = scmp.lt.s32.totalorder %s29_s27, %s29_s27 }
  0x1b   :  { %p224_p11 = scmp.ne.s32.totalorder %s29_s27, %s223_s8  ;;  %p229_p13 = scmp.lt.s32.totalorder %s223_s8, %s223_s8 }
  0x1d   :  { %p230_p0 = por %p229_p13, %p228_p12 }
  0x1f   :  { %p231_p1 = pnand %p230_p0, %p224_p11 }
  0x21   :  { %234 = shalt.err (!%p231_p1)
}
  0x22   :  { %34 = dma.hbm_to_vmem [thread:$0]  %s341_s1, 512, %s29_s27, [#allocation6], %s264_s22, %s264_s22, %s265_s23  }
  0x23   :  { %257 = dma.done.wait [#allocation3], 256  }
  0x24   :  { %258 = vsyncadd [#allocation3], 4294967040 }
  0x25   :  { %259 = dma.done.wait [#allocation6], 512  }
  0x26   :  { %260 = vsyncadd [#allocation6], 4294966784  ;;  %vm56_vm0 = vcmask 261120   ;;  %v45_v0 = vld [vmem:[#allocation5] sm:$0xff]  ;;  %v46_v1 = vld [vmem:[#allocation5 + $0x8] sm:$0xff]  ;;  %s267_s11 = smov [#allocation7]  }
  0x27   :  { %v47_v2 = vld [vmem:[#allocation5 + $0x10] sm:$0xff]  ;;  %v178_v3 = vpack.c.bf16 %v46_v1, %v45_v0  ;;  %v48_v4 = vld [vmem:[#allocation5 + $0x18] sm:$0xff]  ;;  %s145_s12 = sshll.u32 %s267_s11, 4  ;;  %s146_s12 = int_to_ptr.vmem [resolvable:$true] %s145_s12 }
  0x28   :  { %v43_v5 = vld [vmem:[#allocation2] sm:$0xff]  ;;  %v182_v6 = vpack.c.bf16 %v48_v4, %v47_v2  ;;  %v44_v7 = vld [vmem:[#allocation2 + $0x8] sm:$0xff]  ;;  %s235_s13 = scalar_lea.vmem %s146_s12, 256  ;;  %p240_p3 = scmp.lt.s32.totalorder %s146_s12, %s146_s12 }
  0x29   :  { %175 = vmatprep.mubr.msk.f32.mxu0 %vm56_vm0, %v43_v5  ;;  %179 = vmatprep.subr.bf16.mxu0 %v178_v3  ;;  %v158_v8 = vld [vmem:[%s342_s2] ss:$0 sm:$0xff]  ;;  %p236_p2 = scmp.ne.s32.totalorder %s146_s12, %s235_s13  ;;  %p241_p4 = scmp.lt.s32.totalorder %s235_s13, %s235_s13 }
  0x2a   :  { %181 = vmatpush3.bf16.msra.mxu0 %v178_v3 }
  0x2b   :  { %183 = vmatprep.subr.bf16.mxu0 %v182_v6  ;;  %p242_p5 = por %p241_p4, %p240_p3 }
  0x2d   :  { %p243_p6 = pnand %p242_p5, %p236_p2 }
  0x2e   :  { %185 = vmatpush3.bf16.msra.mxu0 %v182_v6 }
  0x31   :  { %176 = vmatmul.mubr.msk.f32.vlgmr.msra.gmra.mrb[0].mxu0 %vm56_vm0, %v44_v7 }
 0x104   :  { %v177_v9 = vpop.f32.mrb[0].mxu0 }
 0x105   :  { %v135_v10 = vadd.f32 %v177_v9, %v158_v8  ;;  %v129_v11 = vpop.f32.mrb[1].mxu0 }
 0x106   :  { %v130_v12 = vadd.f32 %v158_v8, %v129_v11 }
 0x107   :  { %139 = vst.msk [vmem:[#allocation7 + $0x8] sm:$0xff] %vm56_vm0, %v135_v10 }
 0x108   :  { %138 = vst.msk [vmem:[#allocation7] sm:$0xff] %vm56_vm0, %v130_v12 }
 0x109   :  { %246 = shalt.err (!%p243_p6)
}
 0x10a   :  { %s247_s15 = scalar_lea.hbm %s343_s3, 256 }
 0x10b   :  { %p248_p7 = scmp.ne.s32.totalorder %s343_s3, %s247_s15  ;;  %p251_p8 = scmp.lt.u32.totalorder %s247_s15, %s343_s3 }
 0x10d   :  { %p253_p9 = pnand %p251_p8, %p248_p7 }
 0x10f   :  { %256 = shalt.err (!%p253_p9)
}
 0x110   :  { %151 = dma.vmem_to_hbm [thread:$0]  %s146_s12, 256, %s343_s3, [#allocation4], %s264_s22, %s264_s22, %s265_s23  }
 0x111   :  { %261 = dma.done.wait [#allocation4], 256  }
 0x112   :  { %262 = vsyncadd [#allocation4], 4294967040 }
 0x113   :  { %155 = vsyncpa [#allocation3], 1 }
 0x114   :  { %156 = vsyncpa [#allocation6], 1 }
 0x115   :  { %157 = vsyncpa [#allocation4], 1 }

</bundles_post_ra>
